<compile_context>
chip_gen: v6e
topology: v6e:2x2x1
jax: 0.10.0
libtpu: 0.0.40
codegen_flags: <defaults>
</compile_context>

<pallas_src>
import jax
import jax.numpy as jnp
from jax.experimental import pallas as pl
from jax.experimental.pallas import tpu as pltpu


def _round_up(n, m):
    return ((n + m - 1) // m) * m


def _cdiv(a, b):
    return (a + b - 1) // b


def _nbytes(a):
    return a.size * jnp.dtype(a.dtype).itemsize


# --------------------------------------------------------------- kernels ----

def _ffn_kernel_resident(x_ref, w1_ref, b1_ref, w2_ref, b2_ref, o_ref):
    """Whole d_ff in one step; W1/W2 index maps are constant over the grid so
    Pallas fetches them from HBM exactly once."""
    h = jnp.dot(x_ref[...], w1_ref[...], preferred_element_type=jnp.float32)
    g = jnp.maximum(h + b1_ref[...], 0.0)          # ReLU
    # (dropout == identity at inference)
    y = jnp.dot(g.astype(w2_ref.dtype), w2_ref[...],
                preferred_element_type=jnp.float32)
    o_ref[...] = (y + b2_ref[...]).astype(o_ref.dtype)


def _ffn_kernel_streaming(x_ref, w1_ref, b1_ref, w2_ref, b2_ref, o_ref,
                          acc_ref):
    """d_ff streamed in tf-sized tiles along the 'arbitrary' reduction axis."""
    j = pl.program_id(1)
    h = jnp.dot(x_ref[...], w1_ref[...], preferred_element_type=jnp.float32)
    g = jnp.maximum(h + b1_ref[...], 0.0)          # ReLU commutes with d_ff split
    # (dropout == identity at inference)
    contrib = jnp.dot(g.astype(w2_ref.dtype), w2_ref[...],
                      preferred_element_type=jnp.float32)

    @pl.when(j == 0)
    def _():                      # first step writes: no zero-init + RMW
        acc_ref[...] = contrib

    @pl.when(j != 0)
    def _():
        acc_ref[...] += contrib

    @pl.when(j == pl.num_programs(1) - 1)
    def _():
        o_ref[...] = (acc_ref[...] + b2_ref[...]).astype(o_ref.dtype)


# ----------------------------------------------------- tile / VMEM sizing ---

def _vmem_limit_bytes():
    try:
        cap = pltpu.get_tpu_info().vmem_capacity_bytes
    except Exception:
        cap = 64 * 1024 * 1024               # conservative if the query fails
    if cap >= 128 * 1024 * 1024:             # v5e / v6e: use most of 128 MiB
        return 100 * 1024 * 1024
    # v7x (64 MiB physical) or unknown: leave headroom for double buffers,
    # internal scratch and semaphores.
    return max(cap - 8 * 1024 * 1024, cap * 3 // 4)


def _select_tiles(tokens, D, d_ff, x_isz, w_isz, sub, budget,
                  tm_pref, tf_pref, tf_max=None, allow_resident=True):
    """Returns (tm, tf, resident)."""
    tm_cap = _round_up(tokens, sub)

    tm_cands = []
    for c in (tm_pref, 1024, 768, 512, 384, 256, 128, 64, 32, 16, 8):
        c = min(c, tm_cap)
        if c >= sub and c % sub == 0 and c not in tm_cands:
            tm_cands.append(c)
    tm_cands.sort(reverse=True)

    dff128 = _round_up(d_ff, 128)
    cap_tf = dff128 if tf_max is None else min(dff128, _round_up(tf_max, 128))
    tf_cands = []
    for c in (tf_pref, 2048, 1024, 512, 256, 128):
        c = min(_round_up(c, 128), cap_tf)
        if c not in tf_cands:
            tf_cands.append(c)
    tf_cands.sort(reverse=True)

    def act_bytes(tm):
        # x tile + out tile, double-buffered by the pipeline.
        return 2 * 2 * tm * D * x_isz

    def resident_bytes(tm):
        # Conservative: weights/biases budgeted double-buffered even though
        # their constant index maps mean they are only DMA'd once.
        w = 2 * (D * d_ff + d_ff * D + 8 * d_ff + 8 * D) * w_isz
        inter = tm * d_ff * (4 + w_isz) + tm * D * 4   # (tm,d_ff) f32 + cast
        return act_bytes(tm) + w + inter

    def streaming_bytes(tm, tf):
        w = 2 * (D * tf + tf * D + 8 * tf + 8 * D) * w_isz
        acc = tm * D * 4
        inter = tm * tf * (4 + w_isz) + tm * D * 4
        return act_bytes(tm) + w + acc + inter

    # 1) weights-resident path (only for reasonably large token tiles so the
    #    MXU is not starved by a tiny tm).
    if allow_resident:
        min_resident_tm = min(256, tm_cap)
        for tm in tm_cands:
            if tm < min_resident_tm:
                break
            if resident_bytes(tm) <= budget:
                return tm, d_ff, True

    # 2) streaming path: largest tm first (arithmetic intensity ~ tm hides the
    #    weight DMAs on v6e), then the largest tf that fits (fewer accumulator
    #    read-modify-writes / grid steps).
    fallback = None
    for tm in tm_cands:
        for tf in tf_cands:
            if streaming_bytes(tm, tf) <= budget:
                if fallback is None:
                    fallback = (tm, tf)
                if tf >= min(512, tf_cands[0]):
                    return tm, tf, False
                break
    if fallback is not None:
        return fallback[0], fallback[1], False
    return tm_cands[-1], tf_cands[-1], False


# ----------------------------------------------------------------- wrapper --

def feed_forward(x, w1, b1, w2, b2, *, tm=1024, tf=2048,
                 force_streaming=False, tf_max=None):
    """x: (batch, seq, d_model) -> (batch, seq, d_model).

    w1: (d_model, d_ff), b1: (d_ff,), w2: (d_ff, d_model), b2: (d_model,).
    Computes layer2(dropout(relu(layer1(x)))) with dropout == identity.
    """
    B, S, D = x.shape
    d_ff = w1.shape[1]
    tokens = B * S
    x_isz = jnp.dtype(x.dtype).itemsize
    w_isz = jnp.dtype(w1.dtype).itemsize

    # Sublane multiple of the activation dtype (8 f32 / 16 bf16 / 32 int8-fp8).
    sub = {4: 8, 2: 16, 1: 32}.get(x_isz, 8)

    vmem_limit = _vmem_limit_bytes()
    budget = int(vmem_limit * 0.9)

    tm_eff, tf_eff, resident = _select_tiles(
        tokens, D, d_ff, x_isz, w_isz, sub, budget, tm, tf,
        tf_max=tf_max, allow_resident=not force_streaming)

    x2d = x.reshape(tokens, D)
    b1p = b1.reshape(1, d_ff)
    b2p = b2.reshape(1, D)
    w1p, w2p = w1, w2

    # --- token-axis tiling (pad, never assert) ------------------------------
    tokens_p = _round_up(tokens, tm_eff)
    # Resident path: ensure >=2 token tiles so both TensorCores (v7x) /
    # megacore get work.  Weights are not re-fetched, so this is ~free.
    if resident and tokens_p // tm_eff == 1 and tm_eff > sub:
        tm_eff = _round_up(_cdiv(tokens, 2), sub)
        tokens_p = _round_up(tokens, tm_eff)
    if tokens_p != tokens:
        x2d = jnp.pad(x2d, ((0, tokens_p - tokens), (0, 0)))

    # --- d_ff-axis tiling (streaming only).  Zero padding is exact:
    # b1 pad = 0 -> ReLU(0) = 0 -> contributes 0 through zero rows of W2. -----
    d_ff_p = d_ff if resident else _round_up(d_ff, tf_eff)
    if d_ff_p != d_ff:
        pad = d_ff_p - d_ff
        w1p = jnp.pad(w1p, ((0, 0), (0, pad)))
        b1p = jnp.pad(b1p, ((0, 0), (0, pad)))
        w2p = jnp.pad(w2p, ((0, pad), (0, 0)))

    n_tok = tokens_p // tm_eff

    w_bytes = _nbytes(w1p) + _nbytes(w2p) + _nbytes(b1p) + _nbytes(b2p)
    weight_fetches = 1 if resident else n_tok
    cost = pl.CostEstimate(
        flops=4 * tokens_p * D * d_ff_p,                 # two matmuls, 2*M*K*N
        transcendentals=0,
        bytes_accessed=2 * tokens_p * D * x_isz + weight_fetches * w_bytes,
    )

    compiler_params = pltpu.CompilerParams(
        dimension_semantics=(("parallel",) if resident
                             else ("parallel", "arbitrary")),
        vmem_limit_bytes=vmem_limit,
    )

    if resident:
        grid_spec = pltpu.PrefetchScalarGridSpec(
            num_scalar_prefetch=0,
            grid=(n_tok,),
            in_specs=[
                pl.BlockSpec((tm_eff, D), lambda i: (i, 0)),      # x tile
                pl.BlockSpec((D, d_ff_p), lambda i: (0, 0)),      # W1 resident
                pl.BlockSpec((1, d_ff_p), lambda i: (0, 0)),      # b1
                pl.BlockSpec((d_ff_p, D), lambda i: (0, 0)),      # W2 resident
                pl.BlockSpec((1, D), lambda i: (0, 0)),           # b2
            ],
            out_specs=pl.BlockSpec((tm_eff, D), lambda i: (i, 0)),
        )
        kernel = _ffn_kernel_resident
    else:
        grid_spec = pltpu.PrefetchScalarGridSpec(
            num_scalar_prefetch=0,
            grid=(n_tok, d_ff_p // tf_eff),
            in_specs=[
                pl.BlockSpec((tm_eff, D), lambda i, j: (i, 0)),   # x tile
                pl.BlockSpec((D, tf_eff), lambda i, j: (0, j)),   # W1 tile
                pl.BlockSpec((1, tf_eff), lambda i, j: (0, j)),   # b1 tile
                pl.BlockSpec((tf_eff, D), lambda i, j: (j, 0)),   # W2 tile
                pl.BlockSpec((1, D), lambda i, j: (0, 0)),        # b2
            ],
            out_specs=pl.BlockSpec((tm_eff, D), lambda i, j: (i, 0)),
            scratch_shapes=[pltpu.VMEM((tm_eff, D), jnp.float32)],
        )
        kernel = _ffn_kernel_streaming

    out2d = pl.pallas_call(
        kernel,
        out_shape=jax.ShapeDtypeStruct((tokens_p, D), x.dtype),
        grid_spec=grid_spec,
        compiler_params=compiler_params,
        cost_estimate=cost,
    )(x2d, w1p, b1p, w2p, b2p)

    return out2d[:tokens].reshape(B, S, D)


def feed_forward_ref(x, w1, b1, w2, b2):
    g = jnp.maximum(jnp.dot(x, w1) + b1, 0.0)
    return jnp.dot(g, w2) + b2


if __name__ == "__main__":
    key = jax.random.PRNGKey(0)

    def make_params(k, d_model, d_ff, dtype=jnp.float32):
        kw1, kb1, kw2, kb2 = jax.random.split(k, 4)
        w1 = jax.random.normal(kw1, (d_model, d_ff), dtype) * 0.05
        b1 = jax.random.normal(kb1, (d_ff,), dtype) * 0.05
        w2 = jax.random.normal(kw2, (d_ff, d_model), dtype) * 0.05
        b2 = jax.random.normal(kb2, (d_ff if False else d_model,), dtype) * 0.05
        return w1, b1, w2, b2

    k1, k2, kx1, kx2 = jax.random.split(key, 4)

    # Test 1: aligned shapes -> weights-resident path (single d_ff step,
    # weights DMA'd once, >=2 token tiles for megacore/v7x).
    batch, seq, d_model, d_ff = 2, 8, 128, 256
    x = jax.random.normal(kx1, (batch, seq, d_model), jnp.float32)
    w1, b1, w2, b2 = make_params(k1, d_model, d_ff)
    out = jax.block_until_ready(feed_forward(x, w1, b1, w2, b2))
    ref = feed_forward_ref(x, w1, b1, w2, b2)
    assert out.shape == (batch, seq, d_model)
    assert jnp.allclose(out, ref, atol=2e-3, rtol=2e-3), "resident path mismatch"

    # Test 2: unaligned tokens / d_ff, forced streaming path (3 reduction
    # steps: exercises padding + first-step write / accumulate / finalize).
    batch, seq, d_model, d_ff = 2, 7, 128, 320
    x = jax.random.normal(kx2, (batch, seq, d_model), jnp.float32)
    w1, b1, w2, b2 = make_params(k2, d_model, d_ff)
    out = jax.block_until_ready(
        feed_forward(x, w1, b1, w2, b2, force_streaming=True, tf_max=128))
    ref = feed_forward_ref(x, w1, b1, w2, b2)
    assert out.shape == (batch, seq, d_model)
    assert jnp.allclose(out, ref, atol=2e-3, rtol=2e-3), "streaming path mismatch"

    print("KERNEL_OK")
</pallas_src>

<mosaic_0001>
module attributes {stable_mosaic.version = 11 : i64} {
  func.func @_ffn_kernel_resident(%arg0: i32, %arg1: memref<8x128xf32, #tpu.memory_space<vmem>>, %arg2: memref<128x256xf32, #tpu.memory_space<vmem>>, %arg3: memref<1x256xf32, #tpu.memory_space<vmem>>, %arg4: memref<256x128xf32, #tpu.memory_space<vmem>>, %arg5: memref<1x128xf32, #tpu.memory_space<vmem>>, %arg6: memref<8x128xf32, #tpu.memory_space<vmem>>) attributes {dimension_semantics = [#tpu.dimension_semantics<parallel>], iteration_bounds = array<i64: 2>, scalar_prefetch = 0 : i64, scratch_operands = 0 : i64, tpu.core_type = #tpu.core_type<tc>, window_params = [{transform_indices = @transform_0, window_bounds = array<i64: 8, 128>}, {pipeline_mode = #tpu.pipeline_mode<synchronous>, transform_indices = @transform_1, window_bounds = array<i64: 128, 256>}, {pipeline_mode = #tpu.pipeline_mode<synchronous>, transform_indices = @transform_2, window_bounds = array<i64: 1, 256>}, {pipeline_mode = #tpu.pipeline_mode<synchronous>, transform_indices = @transform_3, window_bounds = array<i64: 256, 128>}, {pipeline_mode = #tpu.pipeline_mode<synchronous>, transform_indices = @transform_4, window_bounds = array<i64: 1, 128>}, {transform_indices = @transform_5, window_bounds = array<i64: 8, 128>}]} {
    %c0 = arith.constant 0 : index
    %c0_0 = arith.constant 0 : index
    %0 = vector.load %arg1[%c0, %c0_0] : memref<8x128xf32, #tpu.memory_space<vmem>>, vector<8x128xf32>
    %c0_1 = arith.constant 0 : index
    %c0_2 = arith.constant 0 : index
    %1 = vector.load %arg2[%c0_1, %c0_2] : memref<128x256xf32, #tpu.memory_space<vmem>>, vector<128x256xf32>
    %cst = arith.constant dense<0.000000e+00> : vector<8x256xf32>
    %2 = tpu.matmul %0, %1, %cst {dimension_numbers = #tpu.dot_dimension_numbers<[1], [0], [0], [1], [0, 0, 1, 1], [], []>} : vector<8x128xf32>, vector<128x256xf32>, vector<8x256xf32> -> vector<8x256xf32>
    %c0_3 = arith.constant 0 : index
    %c0_4 = arith.constant 0 : index
    %3 = vector.load %arg3[%c0_3, %c0_4] : memref<1x256xf32, #tpu.memory_space<vmem>>, vector<1x256xf32>
    %4 = vector.broadcast %3 : vector<1x256xf32> to vector<8x256xf32>
    %5 = arith.addf %2, %4 : vector<8x256xf32>
    %cst_5 = arith.constant 0.000000e+00 : f32
    %6 = vector.broadcast %cst_5 : f32 to vector<8x256xf32>
    %7 = arith.maximumf %5, %6 : vector<8x256xf32>
    %c0_6 = arith.constant 0 : index
    %c0_7 = arith.constant 0 : index
    %8 = vector.load %arg4[%c0_6, %c0_7] : memref<256x128xf32, #tpu.memory_space<vmem>>, vector<256x128xf32>
    %cst_8 = arith.constant dense<0.000000e+00> : vector<8x128xf32>
    %9 = tpu.matmul %7, %8, %cst_8 {dimension_numbers = #tpu.dot_dimension_numbers<[1], [0], [0], [1], [0, 0, 1, 1], [], []>} : vector<8x256xf32>, vector<256x128xf32>, vector<8x128xf32> -> vector<8x128xf32>
    %c0_9 = arith.constant 0 : index
    %c0_10 = arith.constant 0 : index
    %10 = vector.load %arg5[%c0_9, %c0_10] : memref<1x128xf32, #tpu.memory_space<vmem>>, vector<1x128xf32>
    %11 = vector.broadcast %10 : vector<1x128xf32> to vector<8x128xf32>
    %12 = arith.addf %9, %11 : vector<8x128xf32>
    %c0_11 = arith.constant 0 : index
    %c0_12 = arith.constant 0 : index
    %13 = vector.load %arg6[%c0_11, %c0_12] : memref<8x128xf32, #tpu.memory_space<vmem>>, vector<8x128xf32>
    tpu.vector_store %arg6[%c0_11, %c0_12], %12 {strides = array<i32>} : memref<8x128xf32, #tpu.memory_space<vmem>>, vector<8x128xf32>,
    return
  }
  func.func @transform_0(%arg0: i32) -> (i32, i32) {
    %c0_i32 = arith.constant 0 : i32
    %c0_i32_0 = arith.constant 0 : i32
    return %arg0, %c0_i32 : i32, i32
  }
  func.func @transform_1(%arg0: i32) -> (i32, i32) {
    %c0_i32 = arith.constant 0 : i32
    %c0_i32_0 = arith.constant 0 : i32
    %c0_i32_1 = arith.constant 0 : i32
    return %c0_i32, %c0_i32_0 : i32, i32
  }
  func.func @transform_2(%arg0: i32) -> (i32, i32) {
    %c0_i32 = arith.constant 0 : i32
    %c0_i32_0 = arith.constant 0 : i32
    %c0_i32_1 = arith.constant 0 : i32
    return %c0_i32, %c0_i32_0 : i32, i32
  }
  func.func @transform_3(%arg0: i32) -> (i32, i32) {
    %c0_i32 = arith.constant 0 : i32
    %c0_i32_0 = arith.constant 0 : i32
    %c0_i32_1 = arith.constant 0 : i32
    return %c0_i32, %c0_i32_0 : i32, i32
  }
  func.func @transform_4(%arg0: i32) -> (i32, i32) {
    %c0_i32 = arith.constant 0 : i32
    %c0_i32_0 = arith.constant 0 : i32
    %c0_i32_1 = arith.constant 0 : i32
    return %c0_i32, %c0_i32_0 : i32, i32
  }
  func.func @transform_5(%arg0: i32) -> (i32, i32) {
    %c0_i32 = arith.constant 0 : i32
    %c0_i32_0 = arith.constant 0 : i32
    return %arg0, %c0_i32 : i32, i32
  }
}

</mosaic_0001>

<bundles_post_ra>
// kernel: tpu_custom_call.1
= control target key start
LH: loop header
LB: loop body
LE: loop exit
PB: predicated region body
PF: predicated region fallthrough
CT: control target
= control target key end

     0   :  { %10 = vsyncpa [#allocation3], 0  ;;  %s1091_s0 = inlined_call_operand.hbm [shape: f32[16,128], index: 0, kind: input, shape index: {}]   ;;  %s1092_s1 = inlined_call_operand.hbm [shape: f32[128,256], index: 1, kind: input, shape index: {}]   ;;  %s1093_s2 = inlined_call_operand.vmem [shape: f32[1,256], index: 2, kind: input, shape index: {}]   ;;  %s1094_s3 = inlined_call_operand.hbm [shape: f32[256,128], index: 3, kind: input, shape index: {}]   ;;  %s1095_s4 = inlined_call_operand.vmem [shape: f32[1,128], index: 4, kind: input, shape index: {}]   ;;  %s1096_s5 = inlined_call_operand.hbm [shape: f32[16,128], index: 5, kind: output, shape index: {}]  }
   0x1   :  { %12 = vsyncpa [#allocation3 + $0x1], 0 }
   0x2   :  { %13 = vsyncpa [#allocation6], 0 }
   0x3   :  { %14 = vsyncpa [#allocation4], 0 }
   0x4   :  { %16 = vsyncpa [#allocation4 + $0x1], 0  ;;  %s913_s18 = smov 0   ;;  %s915_s19 = smov 0  }
   0x5   :  { %s917_s20 = smov 0   ;;  %s919_s21 = smov 0  }
   0x6 LB: > { %s934_s22 = sadd.s32 4294967295, %s872_s21   ;;  %s600_s23 = sadd.s32 4294967294, %s872_s21   ;;  %s872_s21 = sphi %s919_s21, %s1118_s21   ;;  %s868_s20 = sphi %s917_s20, %s1117_s20   ;;  %s864_s19 = sphi %s915_s19, %s1116_s19   ;;  %s860_s18 = sphi %s913_s18, %s1115_s18  }
   0x7   : > { %p42_p0 = scmp.ne.s32.totalorder %s864_s19, %s860_s18  ;;  %p1097_p1 = scmp.eq.s32.totalorder %s934_s22, 0 }
   0x8   : > { %p156_p3 = scmp.eq.s32.totalorder %s600_s23, 1  ;;  %p601_p5 = scmp.ge.s32.totalorder %s872_s21, 1 }
   0x9   : > { %p943_p4 = por %p1097_p1, %p42_p0  ;;  %p163_p7 = scmp.lt.s32.totalorder %s872_s21, 3 }
   0xa   : > { %p948_p6 = por %p156_p3, %p42_p0  ;;  %s874_s27 = smov [#allocation5]  }
   0xb   : > { %s1101_s24 = scalar_select %p943_p4, 1, 0 }
   0xc   : > { %s1102_s25 = scalar_select %p948_p6, 1, 0 }
   0xd   : > { %p953_p8 = pnand %p601_p5, %p163_p7  ;;  %s175_s28 = sshll.u32 %s874_s27, 4  ;;  %s176_s28 = int_to_ptr.vmem [resolvable:$true] %s175_s28 }
   0xe   : > { %s875_s30 = smov [#allocation7]   ;;  %s735_s7 = scalar_lea.vmem %s176_s28, 4096 }
   0xf   : > { %s1103_s26 = scalar_select %p953_p8, 1, 0 }
  0x10   : > { %p664_p9 = pneg %p953_p8  ;;  %s191_s6 = sshll.u32 %s875_s30, 4  ;;  %s192_s6 = int_to_ptr.vmem [resolvable:$true] %s191_s6 }
  0x11   : > { %p736_p13 = scmp.ne.s32.totalorder %s176_s28, %s735_s7  ;;  %p743_p5 = scmp.lt.s32.totalorder %s176_s28, %s176_s28 }
  0x12   : > { %p962_p11 = pnand %p664_p9, %p1097_p1  ;;  %p744_p7 = scmp.lt.s32.totalorder %s735_s7, %s735_s7 }
  0x14   : > { %p726_p12 = pneg %p962_p11  ;;  %p745_p10 = por %p744_p7, %p743_p5 }
  0x16   : > { %p738_p0 = pnand %p736_p13, %p726_p12 }
  0x18   : > { %p739_p3 = pneg %p738_p0 }
  0x1a   : > { %p746_p9 = pnand %p745_p10, %p739_p3 }
  0x1c   : > { %749 = shalt.err (!%p746_p9)
}
  0x1d   : > { %s876_s8 = smov 256   ;;  %s877_s9 = smov 16  }
  0x1e   : > { %667 = dma.hbm_to_vmem [thread:$0]  (!%p962_p11), %s1092_s1, 4096, %s176_s28, [#allocation6], %s876_s8, %s876_s8, %s877_s9  }
  0x1f   : > { %s761_s12 = scalar_lea.vmem %s192_s6, 4096  ;;  %p769_p2 = scmp.lt.s32.totalorder %s192_s6, %s192_s6 }
  0x20   : > { %p762_p1 = scmp.ne.s32.totalorder %s192_s6, %s761_s12  ;;  %p770_p6 = scmp.lt.s32.totalorder %s761_s12, %s761_s12 }
  0x22   : > { %p764_p13 = pnand %p762_p1, %p726_p12  ;;  %p771_p5 = por %p770_p6, %p769_p2 }
  0x24   : > { %p765_p0 = pneg %p764_p13 }
  0x26   : > { %p772_p10 = pnand %p771_p5, %p765_p0 }
  0x28   : > { %775 = shalt.err (!%p772_p10)
}
  0x29   : > { %s878_s13 = smov 128   ;;  %s879_s14 = smov 8  }
  0x2a   : > { %670 = dma.hbm_to_vmem [thread:$0]  (!%p962_p11), %s1094_s3, 4096, %s192_s6, [#allocation6], %s878_s13, %s878_s13, %s879_s14  }
  0x2b   : > { %s985_s17 = sadd.s32 1, %s872_s21   ;;  %s29_s27 = sadd.s32 1, %s868_s20 }
  0x2c   : > { %s26_s23 = ssub.s32 %s872_s21, %s985_s17  ;;  %p36_p2 = scmp.ne.s32.totalorder %s868_s20, %s864_s19 }
  0x2d   : > { %p27_p1 = scmp.eq.s32.totalorder %s26_s23, 0  ;;  %p37_p6 = scmp.eq.s32.totalorder %s872_s21, 0 }
  0x2e   : > { %p1105_p3 = scmp.eq.s32.totalorder %s934_s22, 1  ;;  %p681_p9 = scmp.lt.s32.totalorder %s872_s21, 2 }
  0x2f   : > { %s994_s28 = scalar_select %p27_p1, %s868_s20, %s29_s27  }
  0x30   : > { %p38_p12 = por %p37_p6, %p36_p2  ;;  %p998_p7 = por %p1105_p3, %p36_p2 }
  0x31   : > { %s208_s29 = sand.u32 1, %s868_s20   ;;  %s606_s6 = sshll.u32 %s872_s21, 7 }
  0x32   : > { %s1106_s30 = scalar_select %p998_p7, 1, 0 }
  0x33   : > { %s605_s7 = sshll.u32 %s208_s29, 3  ;;  %s1008_s10 = scalar_lea.hbm %s1091_s0, %s606_s6 }
  0x34   : > { %s212_s11 = scalar_lea.vmem [#allocation2], %s605_s7  ;;  %p1010_p11 = pnand %p681_p9, %p38_p12 }
  0x35   : > { %s219_s12 = sshll.u32 %s212_s11, 4  ;;  %s209_s14 = scalar_lea.sflag [#allocation3], %s208_s29  ;;  %s220_s12 = int_to_ptr.vmem [resolvable:$true] %s219_s12 }
  0x36   : > { %s776_s15 = scalar_lea.hbm %s1008_s10, 128  ;;  %p778_p0 = pneg %p1010_p11 }
  0x37   : > { %p777_p13 = scmp.ne.s32.totalorder %s1008_s10, %s776_s15  ;;  %s781_s27 = scalar_lea.hbm %s1091_s0, 256 }
  0x38   : > { %p782_p1 = scmp.lt.s32.totalorder %s1008_s10, %s1091_s0  ;;  %p783_p2 = scmp.lt.s32.totalorder %s781_s27, %s776_s15 }
  0x39   : > { %p779_p5 = pnand %p778_p0, %p777_p13 }
  0x3a   : > { %p784_p6 = por %p783_p2, %p782_p1 }
  0x3b   : > { %p780_p10 = pneg %p779_p5 }
  0x3d   : > { %p785_p12 = pnand %p784_p6, %p780_p10 }
  0x3f   : > { %788 = shalt.err (!%p785_p12)
}
  0x40   : > { %s789_s8 = scalar_lea.vmem %s220_s12, 128  ;;  %s880_s29 = smov [#allocation2]  }
  0x41   : > { %p790_p3 = scmp.ne.s32.totalorder %s220_s12, %s789_s8  ;;  %s794_s9 = sshll.u32 %s880_s29, 4  ;;  %s795_s9 = int_to_ptr.vmem [resolvable:$false] %s794_s9 }
  0x42   : > { %s796_s11 = scalar_lea.vmem %s795_s9, 256  ;;  %p797_p13 = scmp.lt.s32.totalorder %s220_s12, %s795_s9 }
  0x43   : > { %p792_p9 = pnand %p790_p3, %p778_p0  ;;  %p798_p5 = scmp.lt.s32.totalorder %s796_s11, %s789_s8 }
  0x45   : > { %p793_p7 = pneg %p792_p9  ;;  %p799_p4 = por %p798_p5, %p797_p13 }
  0x47   : > { %p800_p8 = pnand %p799_p4, %p793_p7 }
  0x49   : > { %803 = shalt.err (!%p800_p8)
}
  0x4a   : > { %674 = dma.hbm_to_vmem [thread:$0]  (!%p1010_p11), %s1008_s10, 128, %s220_s12, %s209_s14  }
  0x4b   : > { %p1108_p10 = scmp.ne.s32.totalorder %s1103_s26, 0 }
  0x4c   : > { %s1031_s15 = sand.u32 (!%p1108_p10), 1, %s864_s19   ;;  %p1109_p4 = scmp.ne.s32.totalorder (!%p1108_p10), %s1101_s24, 0 }
  0x4d   : > { %228 = sbr.rel (%p1108_p10) target bundleno = 531 (0x213), region = 40  ;;  %s608_s16 = sshll.u32 (!%p1108_p10), %s1031_s15, 3 }
  0x4e   : > { %s231_s23 = scalar_lea.sflag (!%p1108_p10), [#allocation3], %s1031_s15  ;;  %s1037_s27 = scalar_lea.vmem (!%p1108_p10), [#allocation2], %s608_s16 }
  0x52   : > { %847 = dma.done.wait (%p1109_p4), %s231_s23, 128  }
  0x53   : > { %849 = vsyncadd (%p1109_p4), %s231_s23, 4294967168  ;;  %p1110_p8 = scmp.eq.s32.totalorder %s934_s22, 0 }
  0x55   : > { %851 = dma.done.wait (%p1110_p8), [#allocation6], 8192   ;;  %p1111_p7 = pmov %p1110_p8 }
  0x56   : > { %v881_v0 = vmov 0.0   ;;  %v301_v1 = vld [vmem:[#allocation5 + $0xf8] sm:$0xff]  ;;  %v300_v2 = vld [vmem:[#allocation5 + $0xf0] sm:$0xff]  ;;  %v299_v3 = vld [vmem:[#allocation5 + $0xe8] sm:$0xff]  ;;  %s614_s13 = sshll.u32 %s934_s22, 7  ;;  %s268_s14 = scalar_lea.vmem [#allocation8], %s608_s16 }
  0x57   : > { %853 = vsyncadd (%p1111_p7), [#allocation6], 4294959104  ;;  %378 = vmatprep.mubr.f32.mxu0 %v881_v0  ;;  %314 = vmatprep.subr.mxu0 %v301_v1  ;;  %v298_v4 = vld [vmem:[#allocation5 + $0xe0] sm:$0xff]  ;;  %v297_v5 = vld [vmem:[#allocation5 + $0xd8] sm:$0xff]  ;;  %s511_s6 = sshll.u32 %s268_s14, 4  ;;  %s509_s29 = scalar_lea.hbm %s1096_s5, %s614_s13  ;;  %s512_s6 = int_to_ptr.vmem [resolvable:$true] %s511_s6 }
  0x58   : > { %315 = vmatpush1.msra.mxu0 %v300_v2  ;;  %v296_v6 = vld [vmem:[#allocation5 + $0xd0] sm:$0xff]  ;;  %v295_v7 = vld [vmem:[#allocation5 + $0xc8] sm:$0xff]  ;;  %v294_v8 = vld [vmem:[#allocation5 + $0xc0] sm:$0xff]  ;;  %v304_v2 = vlaneseq  ;;  %s498_s9 = scalar_lea.sflag [#allocation4], %s1031_s15  ;;  %s804_s11 = scalar_lea.vmem %s512_s6, 128 }
  0x59   : > { %316 = vmatprep.subr.mxu0 %v299_v3  ;;  %v293_v9 = vld [vmem:[#allocation5 + $0xb8] sm:$0xff]  ;;  %v292_v10 = vld [vmem:[#allocation5 + $0xb0] sm:$0xff]  ;;  %v291_v11 = vld [vmem:[#allocation5 + $0xa8] sm:$0xff]  ;;  %p805_p11 = scmp.ne.s32.totalorder %s512_s6, %s804_s11  ;;  %p1112_p0 = scmp.ne.s32.totalorder %s1106_s30, 0 }
  0x5a   : > { %317 = vmatpush1.msra.mxu0 %v298_v4  ;;  %v290_v12 = vld [vmem:[#allocation5 + $0xa0] sm:$0xff]  ;;  %v289_v13 = vld [vmem:[#allocation5 + $0x98] sm:$0xff]  ;;  %v288_v14 = vld [vmem:[#allocation5 + $0x90] sm:$0xff]  ;;  %v305_v3 = vshrl.u32 %v304_v2, 7  ;;  %s882_s23 = smov [#allocation8]  }
  0x5b   : > { %318 = vmatprep.subr.mxu0 %v297_v5  ;;  %v418_v15 = vld [vmem:[#allocation7 + $0xf8] sm:$0xff]  ;;  %v417_v17 = vld [vmem:[#allocation7 + $0xf0] sm:$0xff]  ;;  %v287_v18 = vld [vmem:[#allocation5 + $0x88] sm:$0xff]  ;;  %p806_p1 = pnand %p805_p11, %p1112_p0 }
  0x5c   : > { %319 = vmatpush1.msra.mxu0 %v296_v6  ;;  %v402_v16 = vld [vmem:[#allocation7 + $0x78] sm:$0xff]  ;;  %617 = vmatprep.subr.mxu1 %v418_v15  ;;  %v401_v19 = vld [vmem:[#allocation7 + $0x70] sm:$0xff]  ;;  %v286_v20 = vld [vmem:[#allocation5 + $0x80] sm:$0xff]  ;;  %v306_v4 = vsub.s32 0, %v305_v3  ;;  %v310_v6 = vsub.s32 1, %v305_v3 }
  0x5d   : > { %320 = vmatprep.subr.mxu0 %v295_v7  ;;  %618 = vmatpush3.msra.mxu1 %v402_v16  ;;  %v416_v21 = vld [vmem:[#allocation7 + $0xe8] sm:$0xff]  ;;  %v285_v22 = vld [vmem:[#allocation5 + $0x78] sm:$0xff]  ;;  %v284_v24 = vld [vmem:[#allocation5 + $0x70] sm:$0xff]  ;;  %p807_p2 = pneg %p806_p1 }
  0x5e   : > { %321 = vmatpush1.msra.mxu0 %v294_v8  ;;  %619 = vmatprep.subr.mxu1 %v417_v17  ;;  %v400_v23 = vld [vmem:[#allocation7 + $0x68] sm:$0xff]  ;;  %v415_v25 = vld [vmem:[#allocation7 + $0xe0] sm:$0xff]  ;;  %v414_v29 = vld [vmem:[#allocation7 + $0xd8] sm:$0xff] }
  0x5f   : > { %322 = vmatprep.subr.mxu0 %v293_v9  ;;  %620 = vmatpush3.msra.mxu1 %v401_v19  ;;  %v283_v26 = vld [vmem:[#allocation5 + $0x68] sm:$0xff]  ;;  %v399_v27 = vld [vmem:[#allocation7 + $0x60] sm:$0xff]  ;;  %v281_v30 = vld [vmem:[#allocation5 + $0x58] sm:$0xff] }
  0x60   : > { %323 = vmatpush1.msra.mxu0 %v292_v10  ;;  %621 = vmatprep.subr.mxu1 %v416_v21  ;;  %v282_v28 = vld [vmem:[#allocation5 + $0x60] sm:$0xff]  ;;  %v398_v31 = vld [vmem:[#allocation7 + $0x58] sm:$0xff]  ;;  %v280_v32 = vld [vmem:[#allocation5 + $0x50] sm:$0xff] }
  0x61   : > { %324 = vmatprep.subr.mxu0 %v291_v11  ;;  %622 = vmatpush3.msra.mxu1 %v400_v23  ;;  %v413_v33 = vld [vmem:[#allocation7 + $0xd0] sm:$0xff]  ;;  %v279_v34 = vld [vmem:[#allocation5 + $0x48] sm:$0xff]  ;;  %v278_v36 = vld [vmem:[#allocation5 + $0x40] sm:$0xff] }
  0x62   : > { %325 = vmatpush1.msra.mxu0 %v290_v12  ;;  %623 = vmatprep.subr.mxu1 %v415_v25  ;;  %v397_v35 = vld [vmem:[#allocation7 + $0x50] sm:$0xff]  ;;  %v412_v37 = vld [vmem:[#allocation7 + $0xc8] sm:$0xff]  ;;  %v277_v38 = vld [vmem:[#allocation5 + $0x38] sm:$0xff] }
  0x63   : > { %326 = vmatprep.subr.mxu0 %v289_v13  ;;  %624 = vmatpush3.msra.mxu1 %v399_v27  ;;  %v396_v39 = vld [vmem:[#allocation7 + $0x48] sm:$0xff]  ;;  %v276_v40 = vld [vmem:[#allocation5 + $0x30] sm:$0xff]  ;;  %v411_v41 = vld [vmem:[#allocation7 + $0xc0] sm:$0xff] }
  0x64   : > { %327 = vmatpush1.msra.mxu0 %v288_v14  ;;  %625 = vmatprep.subr.mxu1 %v414_v29  ;;  %v275_v42 = vld [vmem:[#allocation5 + $0x28] sm:$0xff]  ;;  %v395_v43 = vld [vmem:[#allocation7 + $0x40] sm:$0xff]  ;;  %v410_v45 = vld [vmem:[#allocation7 + $0xb8] sm:$0xff] }
  0x65   : > { %328 = vmatprep.subr.mxu0 %v287_v18  ;;  %626 = vmatpush3.msra.mxu1 %v398_v31  ;;  %v274_v44 = vld [vmem:[#allocation5 + $0x20] sm:$0xff]  ;;  %v273_v46 = vld [vmem:[#allocation5 + $0x18] sm:$0xff]  ;;  %v272_v48 = vld [vmem:[#allocation5 + $0x10] sm:$0xff] }
  0x66   : > { %329 = vmatpush1.msra.mxu0 %v286_v20  ;;  %627 = vmatprep.subr.mxu1 %v413_v33  ;;  %v394_v47 = vld [vmem:[#allocation7 + $0x38] sm:$0xff]  ;;  %v409_v49 = vld [vmem:[#allocation7 + $0xb0] sm:$0xff]  ;;  %v271_v50 = vld [vmem:[#allocation5 + $0x8] sm:$0xff] }
  0x67   : > { %330 = vmatprep.subr.mxu0 %v285_v22  ;;  %628 = vmatpush3.msra.mxu1 %v397_v35  ;;  %v393_v51 = vld [vmem:[#allocation7 + $0x30] sm:$0xff]  ;;  %v270_v52 = vld [vmem:[#allocation5] sm:$0xff]  ;;  %v408_v53 = vld [vmem:[#allocation7 + $0xa8] sm:$0xff] }
  0x68   : > { %331 = vmatpush1.msra.mxu0 %v284_v24  ;;  %629 = vmatprep.subr.mxu1 %v412_v37  ;;  %v269_v54 = vld [vmem:[%s1037_s27] sm:$0xff]  ;;  %v392_v55 = vld [vmem:[#allocation7 + $0x28] sm:$0xff]  ;;  %v407_v56 = vld [vmem:[#allocation7 + $0xa0] sm:$0xff]  ;;  %s808_s27 = sshll.u32 %s882_s23, 4  ;;  %s809_s27 = int_to_ptr.vmem [resolvable:$false] %s808_s27 }
  0x69   : > { %332 = vmatprep.subr.mxu0 %v283_v26  ;;  %630 = vmatpush3.msra.mxu1 %v396_v39  ;;  %v391_v57 = vld [vmem:[#allocation7 + $0x20] sm:$0xff]  ;;  %v406_v58 = vld [vmem:[#allocation7 + $0x98] sm:$0xff]  ;;  %v405_v60 = vld [vmem:[#allocation7 + $0x90] sm:$0xff]  ;;  %s810_s22 = scalar_lea.vmem %s809_s27, 256  ;;  %p811_p6 = scmp.lt.s32.totalorder %s512_s6, %s809_s27 }
  0x6a   : > { %333 = vmatpush1.msra.mxu0 %v282_v28  ;;  %631 = vmatprep.subr.mxu1 %v411_v41  ;;  %v390_v59 = vld [vmem:[#allocation7 + $0x18] sm:$0xff]  ;;  %v389_v61 = vld [vmem:[#allocation7 + $0x10] sm:$0xff]  ;;  %v404_v62 = vld [vmem:[#allocation7 + $0x88] sm:$0xff]  ;;  %p812_p12 = scmp.lt.s32.totalorder %s810_s22, %s804_s11 }
  0x6b   : > { %334 = vmatprep.subr.mxu0 %v281_v30  ;;  %632 = vmatpush3.msra.mxu1 %v395_v43  ;;  %v388_v63 = vld [vmem:[#allocation7 + $0x8] sm:$0xff]  ;;  %v403_v0 = vld [vmem:[#allocation7 + $0x80] sm:$0xff]  ;;  %v302_v5 = vld [vmem:[%s1093_s2] sm:$0x3] }
  0x6c   : > { %335 = vmatpush1.msra.mxu0 %v280_v32  ;;  %633 = vmatprep.subr.mxu1 %v410_v45  ;;  %v387_v1 = vld [vmem:[#allocation7] sm:$0xff]  ;;  %v307_v7 = vrot.slane %v302_v5, %v306_v4  ;;  %v311_v8 = vrot.slane %v302_v5, %v310_v6  ;;  %v612_v16 = vld [vmem:[%s1095_s4] ss:$0 sm:$0xff]  ;;  %p813_p3 = por %p812_p12, %p811_p6 }
  0x6d   : > { %336 = vmatprep.subr.mxu0 %v279_v34  ;;  %634 = vmatpush3.msra.mxu1 %v394_v47 }
  0x6e   : > { %337 = vmatpush1.msra.mxu0 %v278_v36  ;;  %635 = vmatprep.subr.mxu1 %v409_v49  ;;  %p814_p9 = pnand %p813_p3, %p807_p2 }
  0x6f   : > { %338 = vmatprep.subr.mxu0 %v277_v38  ;;  %636 = vmatpush3.msra.mxu1 %v393_v51 }
  0x70   : > { %339 = vmatpush1.msra.mxu0 %v276_v40  ;;  %637 = vmatprep.subr.mxu1 %v408_v53 }
  0x71   : > { %340 = vmatprep.subr.mxu0 %v275_v42  ;;  %638 = vmatpush3.msra.mxu1 %v392_v55 }
  0x72   : > { %341 = vmatpush1.msra.mxu0 %v274_v44  ;;  %639 = vmatprep.subr.mxu1 %v407_v56 }
  0x73   : > { %342 = vmatprep.subr.mxu0 %v273_v46  ;;  %640 = vmatpush3.msra.mxu1 %v391_v57 }
  0x74   : > { %343 = vmatpush1.msra.mxu0 %v272_v48  ;;  %641 = vmatprep.subr.mxu1 %v406_v58 }
  0x75   : > { %344 = vmatprep.subr.mxu0 %v271_v50  ;;  %642 = vmatpush3.msra.mxu1 %v390_v59 }
  0x76   : > { %345 = vmatpush1.msra.mxu0 %v270_v52  ;;  %643 = vmatprep.subr.mxu1 %v405_v60 }
  0x77   : > { %379 = vmatmul.mubr.f32.vlgmr.msra.gmra.mxu0 %v269_v54  ;;  %644 = vmatpush3.msra.mxu1 %v389_v61 }
  0x78   : > { %645 = vmatprep.subr.mxu1 %v404_v62 }
  0x79   : > { %646 = vmatpush3.msra.mxu1 %v388_v63 }
  0x7a   : > { %647 = vmatprep.subr.mxu1 %v403_v0 }
  0x7b   : > { %648 = vmatpush3.msra.mxu1 %v387_v1 }
 0x137   : > { %v380_v9 = vpop.f32.mrf.mxu0 }
 0x138   : > { %v381_v10 = vadd.f32 %v380_v9, %v307_v7 }
 0x139   : > { %v382_v11 = vpop.f32.mrf.mxu0 }
 0x13a   : > { %v383_v12 = vadd.f32 %v382_v11, %v311_v8  ;;  %v385_v14 = vmax.f32 %v381_v10, 0.0 }
 0x13c   : > { %v386_v13 = vmax.f32 %v383_v12, 0.0 }
 0x13e   : > { %490 = vmatprep.mubr.f32.mxu1 %v386_v13 }
 0x13f   : > { %491 = vmatmul.mubr.f32.vlgmr.msra.gmra.mxu1 %v385_v14 }
 0x1ff   : > { %v649_v15 = vpop.f32.mrf.mxu1 }
 0x201   : > { %v650_v17 = vpop.f32.mrf.mxu1 }
 0x202   : > { %v651_v18 = vadd.f32 %v650_v17, %v649_v15 }
 0x204   : > { %v493_v19 = vadd.f32 %v651_v18, %v612_v16 }
 0x206   : > { %496 = vst [vmem:[%s268_s14] sm:$0xff] %v493_v19 }
 0x207   : > { %817 = shalt.err (!%p814_p9)
}
 0x208   : > { %s818_s16 = scalar_lea.hbm %s509_s29, 128  ;;  %s822_s26 = scalar_lea.hbm %s1096_s5, 256 }
 0x209   : > { %p819_p13 = scmp.ne.s32.totalorder %s509_s29, %s818_s16  ;;  %p823_p4 = scmp.lt.s32.totalorder %s509_s29, %s1096_s5 }
 0x20a   : > { %p824_p8 = scmp.lt.s32.totalorder %s822_s26, %s818_s16 }
 0x20b   : > { %p820_p5 = pnand %p819_p13, %p1112_p0 }
 0x20c   : > { %p825_p7 = por %p824_p8, %p823_p4 }
 0x20d   : > { %p821_p10 = pneg %p820_p5 }
 0x20f   : > { %p826_p11 = pnand %p825_p7, %p821_p10 }
 0x211   : > { %829 = shalt.err (!%p826_p11)
}
 0x212   : > { %662 = dma.vmem_to_hbm [thread:$0]  (%p1112_p0), %s512_s6, 128, %s509_s29, %s498_s9  }
 0x213 PF: > { %s523_s13 = sand.u32 1, %s860_s18   ;;  %p1113_p1 = scmp.ne.s32.totalorder %s1102_s25, 0 }
 0x214   : > { %p1114_p2 = scmp.ge.s32.totalorder %s872_s21, 2  ;;  %s524_s14 = scalar_lea.sflag [#allocation4], %s523_s13 }
 0x216   : > { %p676_p6 = pnand %p1114_p2, %p1113_p1 }
 0x218   : > { %p677_p12 = pneg %p676_p6 }
 0x21a   : > { %855 = dma.done.wait (%p677_p12), %s524_s14, 128  }
 0x21b   : > { %857 = vsyncadd (%p677_p12), %s524_s14, 4294967168  ;;  %p19_p3 = scmp.ge.s32.totalorder %s985_s17, 4   ;;  %s1115_s18 = smov %s864_s19 }
 0x21c   : > { %s1116_s19 = smov %s868_s20  ;;  %s1117_s20 = smov %s994_s28 }
 0x21d   : > { %s1118_s21 = smov %s985_s17  ;;  %21 = sbr.rel (!%p19_p3) target bundleno = 6 (0x6), region = 93 }
 0x222   :  { %529 = vsyncpa [#allocation3], 1 }
 0x223   :  { %531 = vsyncpa [#allocation3 + $0x1], 1 }
 0x224   :  { %532 = vsyncpa [#allocation6], 1 }
 0x225   :  { %533 = vsyncpa [#allocation4], 1 }
 0x226   :  { %535 = vsyncpa [#allocation4 + $0x1], 1 }

</bundles_post_ra>
